<compile_context>
chip_gen: v7x
topology: tpu7x:2x2x1
jax: 0.10.0
libtpu: 0.0.40
codegen_flags: <defaults>
</compile_context>

<pallas_src>
import functools

import jax
import jax.numpy as jnp
from jax.experimental import pallas as pl
from jax.experimental.pallas import tpu as pltpu

EPS = 1e-5  # nn.BatchNorm1d default eps


def _round_up(v, m):
    return (v + m - 1) // m * m


def bn_linear_kernel(x_ref, w_ref, b_ref, gamma_ref, beta_ref, o_ref, *, n_valid):
    # Linear: (N_pad, D_pad) @ (D_pad, TILE_H) on the MXU, bf16 inputs, f32 accumulate.
    y = jnp.dot(x_ref[...], w_ref[...], preferred_element_type=jnp.float32)
    y = y + b_ref[...]                                   # (N_pad, TILE_H) + (1, TILE_H)

    # BatchNorm1d, training-mode batch statistics, biased 1/N variance, all in f32.
    # Single pass: sum and sum-of-squares issued back to back (one VPU sweep, two
    # XLU reductions); var = E[y^2] - mean^2, clamped at 0.
    n_pad = y.shape[0]
    if n_pad != n_valid:
        # Zero any padded batch rows so they do not contaminate the statistics.
        row = jax.lax.broadcasted_iota(jnp.int32, y.shape, 0)
        y_stat = jnp.where(row < n_valid, y, 0.0)
    else:
        y_stat = y
    inv_n = 1.0 / n_valid
    s = jnp.sum(y_stat, axis=0, keepdims=True)           # (1, TILE_H)
    sq = jnp.sum(y_stat * y_stat, axis=0, keepdims=True)  # (1, TILE_H)
    mean = s * inv_n
    var = jnp.maximum(sq * inv_n - mean * mean, 0.0)

    z = (y - mean) * jax.lax.rsqrt(var + EPS)            # rsqrt -> EUP slot (free)
    z = gamma_ref[...] * z + beta_ref[...]

    # activation = ReLU
    z = jnp.maximum(z, 0.0)

    # TODO(synk): nn.Dropout in training mode draws a random mask; treated as
    # identity here (inference semantics).
    o_ref[...] = z.astype(o_ref.dtype)


def bn_linear(x, w, b, gamma, beta, *, tile_h=128, matmul_dtype=jnp.bfloat16):
    """x: (N, D_in) f32; w: (D_in, H); b, gamma, beta: (1, H). Returns (N, H) f32."""
    n, d_in = x.shape
    h = w.shape[1]
    assert tile_h % 128 == 0

    n_pad = _round_up(n, 8)
    d_pad = _round_up(d_in, 128)
    h_pad = _round_up(h, tile_h)

    in_bytes = jnp.dtype(matmul_dtype).itemsize
    x_p = jnp.pad(x, ((0, n_pad - n), (0, d_pad - d_in))).astype(matmul_dtype)
    w_p = jnp.pad(w, ((0, d_pad - d_in), (0, h_pad - h))).astype(matmul_dtype)
    b_p = jnp.pad(b.astype(jnp.float32), ((0, 0), (0, h_pad - h)))
    g_p = jnp.pad(gamma.astype(jnp.float32), ((0, 0), (0, h_pad - h)))
    be_p = jnp.pad(beta.astype(jnp.float32), ((0, 0), (0, h_pad - h)))

    # Per-step VMEM estimate (double-buffered inputs + output), capped at 32 MiB
    # so the same tiling fits v5e/v6e (128 MiB) and v7x (64 MiB physical).
    est = (2 * n_pad * d_pad * in_bytes + 2 * d_pad * tile_h * in_bytes
           + 2 * n_pad * tile_h * 4 + 6 * tile_h * 4)
    vmem_limit = min(max(2 * est, 4 << 20), 32 << 20)
    # TODO(synk): if (N, D_in) grows past this budget, add a trailing K grid axis
    # with a VMEM f32 accumulator (and a two-pass sum/sumsq BN if N is tiled).
    assert est <= (32 << 20), "shapes too large for single-block-K tiling"

    grid = (h_pad // tile_h,)
    kernel = functools.partial(bn_linear_kernel, n_valid=n)
    out = pl.pallas_call(
        kernel,
        out_shape=jax.ShapeDtypeStruct((n_pad, h_pad), jnp.float32),
        grid=grid,
        in_specs=[
            pl.BlockSpec((n_pad, d_pad), lambda j: (0, 0)),    # x: full batch, reused
            pl.BlockSpec((d_pad, tile_h), lambda j: (0, j)),   # weight column tile
            pl.BlockSpec((1, tile_h), lambda j: (0, j)),       # bias
            pl.BlockSpec((1, tile_h), lambda j: (0, j)),       # gamma
            pl.BlockSpec((1, tile_h), lambda j: (0, j)),       # beta
        ],
        out_specs=pl.BlockSpec((n_pad, tile_h), lambda j: (0, j)),
        compiler_params=pltpu.CompilerParams(
            dimension_semantics=("parallel",),   # H tiles independent -> 2 TCs on v7x
            vmem_limit_bytes=vmem_limit,
        ),
    )(x_p, w_p, b_p, g_p, be_p)
    return out[:n, :h]


def reference_matched(x, w, b, gamma, beta, matmul_dtype=jnp.bfloat16):
    """Same numerics as the kernel: bf16 MXU inputs, f32 accumulate, f32 BN."""
    y = jnp.dot(x.astype(matmul_dtype), w.astype(matmul_dtype),
                preferred_element_type=jnp.float32) + b
    n = y.shape[0]
    mean = jnp.sum(y, axis=0, keepdims=True) / n
    var = jnp.maximum(jnp.sum(y * y, axis=0, keepdims=True) / n - mean * mean, 0.0)
    z = gamma * (y - mean) * jax.lax.rsqrt(var + EPS) + beta
    return jnp.maximum(z, 0.0)


def reference_f32(x, w, b, gamma, beta):
    """PyTorch-style full-f32 reference (loose check for the bf16 matmul path)."""
    y = x @ w + b
    mean = jnp.mean(y, axis=0, keepdims=True)
    var = jnp.mean((y - mean) ** 2, axis=0, keepdims=True)
    y_hat = (y - mean) / jnp.sqrt(var + EPS)
    return jnp.maximum(gamma * y_hat + beta, 0.0)


if __name__ == "__main__":
    # Small shapes consistent with the module: batch=8, input_size=16, hidden=32.
    N, D_IN, HIDDEN = 8, 16, 32

    key = jax.random.PRNGKey(0)
    kx, kw, kb = jax.random.split(key, 3)

    x = jax.random.normal(kx, (N, D_IN), dtype=jnp.float32)

    # Linear init: uniform(-1/sqrt(fan_in), 1/sqrt(fan_in)); BN: gamma=1, beta=0.
    bound = 1.0 / (D_IN ** 0.5)
    w = jax.random.uniform(kw, (D_IN, HIDDEN), minval=-bound, maxval=bound,
                           dtype=jnp.float32)
    b = jax.random.uniform(kb, (1, HIDDEN), minval=-bound, maxval=bound,
                           dtype=jnp.float32)
    gamma = jnp.ones((1, HIDDEN), dtype=jnp.float32)
    beta = jnp.zeros((1, HIDDEN), dtype=jnp.float32)

    out = jax.block_until_ready(bn_linear(x, w, b, gamma, beta))
    assert out.shape == (N, HIDDEN)

    # Tight check vs a reference with identical matmul precision.
    ref_m = reference_matched(x, w, b, gamma, beta)
    assert jnp.allclose(out, ref_m, atol=1e-4, rtol=1e-4), "mismatch vs matched reference"

    # Loose check vs the full-f32 PyTorch-style reference (bf16 MXU inputs).
    ref_f = reference_f32(x, w, b, gamma, beta)
    max_diff = float(jnp.max(jnp.abs(out - ref_f)))
    assert max_diff < 0.1, f"unexpectedly large deviation from f32 reference: {max_diff}"

    print("KERNEL_OK")
</pallas_src>

<mosaic_0001>
module attributes {stable_mosaic.version = 11 : i64} {
  func.func @bn_linear_kernel(%arg0: i32, %arg1: memref<8x128xbf16, #tpu.memory_space<vmem>>, %arg2: memref<128x128xbf16, #tpu.memory_space<vmem>>, %arg3: memref<1x128xf32, #tpu.memory_space<vmem>>, %arg4: memref<1x128xf32, #tpu.memory_space<vmem>>, %arg5: memref<1x128xf32, #tpu.memory_space<vmem>>, %arg6: memref<8x128xf32, #tpu.memory_space<vmem>>) attributes {dimension_semantics = [#tpu.dimension_semantics<parallel>], iteration_bounds = array<i64: 1>, scalar_prefetch = 0 : i64, scratch_operands = 0 : i64, tpu.core_type = #tpu.core_type<tc>, window_params = [{pipeline_mode = #tpu.pipeline_mode<synchronous>, transform_indices = @transform_0, window_bounds = array<i64: 8, 128>}, {transform_indices = @transform_1, window_bounds = array<i64: 128, 128>}, {transform_indices = @transform_2, window_bounds = array<i64: 1, 128>}, {transform_indices = @transform_3, window_bounds = array<i64: 1, 128>}, {transform_indices = @transform_4, window_bounds = array<i64: 1, 128>}, {transform_indices = @transform_5, window_bounds = array<i64: 8, 128>}]} {
    %c0 = arith.constant 0 : index
    %c0_0 = arith.constant 0 : index
    %0 = vector.load %arg1[%c0, %c0_0] : memref<8x128xbf16, #tpu.memory_space<vmem>>, vector<8x128xbf16>
    %c0_1 = arith.constant 0 : index
    %c0_2 = arith.constant 0 : index
    %1 = vector.load %arg2[%c0_1, %c0_2] : memref<128x128xbf16, #tpu.memory_space<vmem>>, vector<128x128xbf16>
    %cst = arith.constant dense<0.000000e+00> : vector<8x128xf32>
    %2 = tpu.matmul %0, %1, %cst {dimension_numbers = #tpu.dot_dimension_numbers<[1], [0], [0], [1], [0, 0, 1, 1], [], []>} : vector<8x128xbf16>, vector<128x128xbf16>, vector<8x128xf32> -> vector<8x128xf32>
    %c0_3 = arith.constant 0 : index
    %c0_4 = arith.constant 0 : index
    %3 = vector.load %arg3[%c0_3, %c0_4] : memref<1x128xf32, #tpu.memory_space<vmem>>, vector<1x128xf32>
    %4 = vector.broadcast %3 : vector<1x128xf32> to vector<8x128xf32>
    %5 = arith.addf %2, %4 : vector<8x128xf32>
    %cst_5 = arith.constant dense<0.000000e+00> : vector<128xf32>
    %6 = vector.multi_reduction <add>, %5, %cst_5 [0] : vector<8x128xf32> to vector<128xf32>
    %7 = vector.shape_cast %6 : vector<128xf32> to vector<1x128xf32>
    %8 = arith.mulf %5, %5 : vector<8x128xf32>
    %cst_6 = arith.constant dense<0.000000e+00> : vector<128xf32>
    %9 = vector.multi_reduction <add>, %8, %cst_6 [0] : vector<8x128xf32> to vector<128xf32>
    %10 = vector.shape_cast %9 : vector<128xf32> to vector<1x128xf32>
    %cst_7 = arith.constant 1.250000e-01 : f32
    %11 = vector.broadcast %cst_7 : f32 to vector<1x128xf32>
    %12 = arith.mulf %7, %11 : vector<1x128xf32>
    %cst_8 = arith.constant 1.250000e-01 : f32
    %13 = vector.broadcast %cst_8 : f32 to vector<1x128xf32>
    %14 = arith.mulf %10, %13 : vector<1x128xf32>
    %15 = arith.mulf %12, %12 : vector<1x128xf32>
    %16 = arith.subf %14, %15 : vector<1x128xf32>
    %cst_9 = arith.constant 0.000000e+00 : f32
    %17 = vector.broadcast %cst_9 : f32 to vector<1x128xf32>
    %18 = arith.maximumf %16, %17 : vector<1x128xf32>
    %19 = vector.broadcast %12 : vector<1x128xf32> to vector<8x128xf32>
    %20 = arith.subf %5, %19 : vector<8x128xf32>
    %cst_10 = arith.constant 9.99999974E-6 : f32
    %21 = vector.broadcast %cst_10 : f32 to vector<1x128xf32>
    %22 = arith.addf %18, %21 : vector<1x128xf32>
    %23 = math.rsqrt %22 : vector<1x128xf32>
    %24 = vector.broadcast %23 : vector<1x128xf32> to vector<8x128xf32>
    %25 = arith.mulf %20, %24 : vector<8x128xf32>
    %c0_11 = arith.constant 0 : index
    %c0_12 = arith.constant 0 : index
    %26 = vector.load %arg4[%c0_11, %c0_12] : memref<1x128xf32, #tpu.memory_space<vmem>>, vector<1x128xf32>
    %27 = vector.broadcast %26 : vector<1x128xf32> to vector<8x128xf32>
    %28 = arith.mulf %27, %25 : vector<8x128xf32>
    %c0_13 = arith.constant 0 : index
    %c0_14 = arith.constant 0 : index
    %29 = vector.load %arg5[%c0_13, %c0_14] : memref<1x128xf32, #tpu.memory_space<vmem>>, vector<1x128xf32>
    %30 = vector.broadcast %29 : vector<1x128xf32> to vector<8x128xf32>
    %31 = arith.addf %28, %30 : vector<8x128xf32>
    %cst_15 = arith.constant 0.000000e+00 : f32
    %32 = vector.broadcast %cst_15 : f32 to vector<8x128xf32>
    %33 = arith.maximumf %31, %32 : vector<8x128xf32>
    %c0_16 = arith.constant 0 : index
    %c0_17 = arith.constant 0 : index
    %34 = vector.load %arg6[%c0_16, %c0_17] : memref<8x128xf32, #tpu.memory_space<vmem>>, vector<8x128xf32>
    tpu.vector_store %arg6[%c0_16, %c0_17], %33 {strides = array<i32>} : memref<8x128xf32, #tpu.memory_space<vmem>>, vector<8x128xf32>,
    return
  }
  func.func @transform_0(%arg0: i32) -> (i32, i32) {
    %c0_i32 = arith.constant 0 : i32
    %c0_i32_0 = arith.constant 0 : i32
    %c0_i32_1 = arith.constant 0 : i32
    return %c0_i32, %c0_i32_0 : i32, i32
  }
  func.func @transform_1(%arg0: i32) -> (i32, i32) {
    %c0_i32 = arith.constant 0 : i32
    %c0_i32_0 = arith.constant 0 : i32
    return %c0_i32, %arg0 : i32, i32
  }
  func.func @transform_2(%arg0: i32) -> (i32, i32) {
    %c0_i32 = arith.constant 0 : i32
    %c0_i32_0 = arith.constant 0 : i32
    return %c0_i32, %arg0 : i32, i32
  }
  func.func @transform_3(%arg0: i32) -> (i32, i32) {
    %c0_i32 = arith.constant 0 : i32
    %c0_i32_0 = arith.constant 0 : i32
    return %c0_i32, %arg0 : i32, i32
  }
  func.func @transform_4(%arg0: i32) -> (i32, i32) {
    %c0_i32 = arith.constant 0 : i32
    %c0_i32_0 = arith.constant 0 : i32
    return %c0_i32, %arg0 : i32, i32
  }
  func.func @transform_5(%arg0: i32) -> (i32, i32) {
    %c0_i32 = arith.constant 0 : i32
    %c0_i32_0 = arith.constant 0 : i32
    return %c0_i32, %arg0 : i32, i32
  }
}

</mosaic_0001>

<bundles_post_ra>
// kernel: tpu_custom_call.1
= control target key start
LH: loop header
LB: loop body
LE: loop exit
PB: predicated region body
PF: predicated region fallthrough
CT: control target
= control target key end

     0   :  { %10 = vsyncpa [#allocation3], 0  ;;  %s434_s0 = inlined_call_operand.hbm [shape: bf16[8,128], index: 0, kind: input, shape index: {}]   ;;  %s435_s1 = inlined_call_operand.hbm [shape: bf16[128,128], index: 1, kind: input, shape index: {}]   ;;  %s436_s2 = inlined_call_operand.vmem [shape: f32[1,128], index: 2, kind: input, shape index: {}]   ;;  %s437_s3 = inlined_call_operand.vmem [shape: f32[1,128], index: 3, kind: input, shape index: {}]   ;;  %s438_s4 = inlined_call_operand.vmem [shape: f32[1,128], index: 4, kind: input, shape index: {}]   ;;  %s439_s5 = inlined_call_operand.hbm [shape: f32[8,128], index: 5, kind: output, shape index: {}]  }
   0x1   :  { %11 = vsyncpa [#allocation6], 0 }
   0x2   :  { %12 = vsyncpa [#allocation4], 0  ;;  %s345_s18 = smov [#allocation2]   ;;  %s346_s20 = smov [#allocation5]  }
   0x3   :  { %s19_s19 = sshll.u32 %s345_s18, 4  ;;  %s28_s21 = sshll.u32 %s346_s20, 4  ;;  %s20_s19 = int_to_ptr.vmem [resolvable:$true] %s19_s19  ;;  %s382_s21 = int_to_ptr.vmem [resolvable:$true] %s28_s21 }
   0x4   :  { %s273_s24 = scalar_lea.hbm %s434_s0, 64 }
   0x5   :  { %p274_p0 = scmp.ne.s32.totalorder %s434_s0, %s273_s24  ;;  %p277_p1 = scmp.lt.u32.totalorder %s273_s24, %s434_s0 }
   0x7   :  { %p279_p2 = pnand %p277_p1, %p274_p0 }
   0x9   :  { %282 = shalt.err (!%p279_p2)
}
   0xa   :  { %s283_s29 = scalar_lea.vmem %s20_s19, 64  ;;  %p288_p4 = scmp.lt.s32.totalorder %s20_s19, %s20_s19 }
   0xb   :  { %p284_p3 = scmp.ne.s32.totalorder %s20_s19, %s283_s29  ;;  %p289_p5 = scmp.lt.s32.totalorder %s283_s29, %s283_s29 }
   0xd   :  { %p290_p6 = por %p289_p5, %p288_p4 }
   0xf   :  { %p291_p7 = pnand %p290_p6, %p284_p3 }
  0x11   :  { %294 = shalt.err (!%p291_p7)
}
  0x12   :  { %22 = dma.hbm_to_vmem [thread:$0]  %s434_s0, 64, %s20_s19, [#allocation3]  }
  0x13   :  { %s295_s9 = scalar_lea.hbm %s435_s1, 1024 }
  0x14   :  { %p296_p8 = scmp.ne.s32.totalorder %s435_s1, %s295_s9  ;;  %p299_p9 = scmp.lt.u32.totalorder %s295_s9, %s435_s1 }
  0x16   :  { %p301_p10 = pnand %p299_p9, %p296_p8 }
  0x18   :  { %304 = shalt.err (!%p301_p10)
}
  0x19   :  { %s305_s14 = scalar_lea.vmem %s382_s21, 1024  ;;  %p310_p12 = scmp.lt.s32.totalorder %s382_s21, %s382_s21 }
  0x1a   :  { %p306_p11 = scmp.ne.s32.totalorder %s382_s21, %s305_s14  ;;  %p311_p13 = scmp.lt.s32.totalorder %s305_s14, %s305_s14 }
  0x1c   :  { %p312_p0 = por %p311_p13, %p310_p12 }
  0x1e   :  { %p313_p1 = pnand %p312_p0, %p306_p11 }
  0x20   :  { %316 = shalt.err (!%p313_p1)
}
  0x21   :  { %s347_s0 = smov 64   ;;  %s348_s15 = smov 4  }
  0x22   :  { %34 = dma.hbm_to_vmem [thread:$0]  %s435_s1, 1024, %s382_s21, [#allocation6], %s347_s0, %s347_s0, %s348_s15  }
  0x23   :  { %339 = dma.done.wait [#allocation3], 64  }
  0x24   :  { %340 = vsyncadd [#allocation3], 4294967232 }
  0x25   :  { %341 = dma.done.wait [#allocation6], 1024  }
  0x26   :  { %342 = vsyncadd [#allocation6], 4294966272  ;;  %v349_v0 = vmov 0.0   ;;  %vm350_vm0 = vmmov 0   ;;  %v263_v1 = vld [vmem:[#allocation5] sm:$0xff]   ;;  %v264_v2 = vld [vmem:[#allocation5 + $0x8] sm:$0xff]  }
  0x27   :  { %236 = vmatprep.subr.bf16.mxu0 %v349_v0  ;;  %252 = vmatprep.mubr.msk.bf16.mxu0 %vm350_vm0, %v349_v0  ;;  %v265_v3 = vld [vmem:[#allocation5 + $0x10] sm:$0xff]   ;;  %v266_v4 = vld [vmem:[#allocation5 + $0x18] sm:$0xff]   ;;  %v267_v5 = vld [vmem:[#allocation5 + $0x20] sm:$0xff]   ;;  %s351_s22 = smov [#allocation7]  }
  0x28   :  { %237 = vmatpush3.bf16.msra.mxu0 %v263_v1  ;;  %v268_v6 = vld [vmem:[#allocation5 + $0x28] sm:$0xff]   ;;  %v269_v7 = vld [vmem:[#allocation5 + $0x30] sm:$0xff]   ;;  %v270_v8 = vld [vmem:[#allocation5 + $0x38] sm:$0xff]   ;;  %s206_s23 = sshll.u32 %s351_s22, 4  ;;  %s207_s23 = int_to_ptr.vmem [resolvable:$true] %s206_s23 }
  0x29   :  { %238 = vmatprep.subr.bf16.mxu0 %v349_v0  ;;  %v48_v9 = vld [vmem:[#allocation2] sm:$0xf]  ;;  %s317_s24 = scalar_lea.vmem %s207_s23, 128  ;;  %p322_p3 = scmp.lt.s32.totalorder %s207_s23, %s207_s23 }
  0x2a   :  { %v216_v10 = vld [vmem:[%s436_s2] ss:$0 sm:$0xff]  ;;  %p318_p2 = scmp.ne.s32.totalorder %s207_s23, %s317_s24  ;;  %p323_p4 = scmp.lt.s32.totalorder %s317_s24, %s317_s24 }
  0x2b   :  { %v225_v37 = vld [vmem:[%s437_s3] ss:$0 sm:$0xff] }
  0x2c   :  { %239 = vmatpush3.bf16.msra.mxu0 %v264_v2  ;;  %v226_v39 = vld [vmem:[%s438_s4] ss:$0 sm:$0xff]  ;;  %p324_p5 = por %p323_p4, %p322_p3 }
  0x2d   :  { %240 = vmatprep.subr.bf16.mxu0 %v349_v0 }
  0x2e   :  { %p325_p6 = pnand %p324_p5, %p318_p2 }
  0x30   :  { %241 = vmatpush3.bf16.msra.mxu0 %v265_v3 }
  0x31   :  { %242 = vmatprep.subr.bf16.mxu0 %v349_v0 }
  0x34   :  { %243 = vmatpush3.bf16.msra.mxu0 %v266_v4 }
  0x35   :  { %244 = vmatprep.subr.bf16.mxu0 %v349_v0 }
  0x38   :  { %245 = vmatpush3.bf16.msra.mxu0 %v267_v5 }
  0x39   :  { %246 = vmatprep.subr.bf16.mxu0 %v349_v0 }
  0x3c   :  { %247 = vmatpush3.bf16.msra.mxu0 %v268_v6 }
  0x3d   :  { %248 = vmatprep.subr.bf16.mxu0 %v349_v0 }
  0x40   :  { %249 = vmatpush3.bf16.msra.mxu0 %v269_v7 }
  0x41   :  { %250 = vmatprep.subr.bf16.mxu0 %v349_v0 }
  0x44   :  { %251 = vmatpush3.bf16.msra.mxu0 %v270_v8 }
  0x47   :  { %253 = vmatmul.mubr.bf16.vlgmr.msra.gmra.mrb[0].mxu0 %v48_v9 }
 0x11a   :  { %v154_v11 = vpop.f32.mrb[0].mxu0 }
 0x11b   :  { %v155_v12 = vadd.f32 %v216_v10, %v154_v11  ;;  %v254_v13 = vpop.f32.mrb[1].mxu0 }
 0x11c   :  { %v157_v14 = vpop.f32.mrb[2].mxu0 }
 0x11d   :  { %v160_v15 = vrot.slane %v155_v12, 4  ;;  %v166_v16 = vmul.f32 %v155_v12, %v155_v12  ;;  %v255_v17 = vpop.f32.mrb[3].mxu0 }
 0x11f   :  { %v161_v18 = vadd.f32 %v160_v15, %v155_v12  ;;  %v167_v19 = vrot.slane %v166_v16, 4 }
 0x121   :  { %v162_v20 = vrot.slane %v161_v18, 2  ;;  %v168_v21 = vadd.f32 %v167_v19, %v166_v16 }
 0x123   :  { %v163_v22 = vadd.f32 %v162_v20, %v161_v18  ;;  %v169_v23 = vrot.slane %v168_v21, 2 }
 0x125   :  { %v164_v24 = vrot.slane %v163_v22, 1  ;;  %v170_v25 = vadd.f32 %v169_v23, %v168_v21 }
 0x127   :  { %v165_v26 = vadd.f32 %v164_v24, %v163_v22  ;;  %v171_v27 = vrot.slane %v170_v25, 1 }
 0x129   :  { %v172_v28 = vadd.f32 %v171_v27, %v170_v25  ;;  %v173_v29 = vmul.f32 0.125, %v165_v26 }
 0x12b   :  { %v174_v30 = vmul.f32 0.125, %v172_v28  ;;  %v175_v31 = vmul.f32 %v173_v29, %v173_v29  ;;  %v178_v35 = vsub.f32 %v155_v12, %v173_v29 }
 0x12d   :  { %v176_v32 = vsub.f32 %v174_v30, %v175_v31 }
 0x12f   :  { %v177_v33 = vmax.f32 %v176_v32, 0.0 }
 0x131   :  { %v179_v34 = vadd.f32 1e-05, %v177_v33 }
 0x133   :  { %271 = vrsqrt.f32 %v179_v34 }
 0x13d   :  { %v272_v36 = vpop.eup %271 }
 0x13e   :  { %v181_v38 = vmul.f32 %v272_v36, %v178_v35 }
 0x140   :  { %v189_v40 = vmul.f32 %v225_v37, %v181_v38 }
 0x142   :  { %v197_v41 = vadd.f32 %v226_v39, %v189_v40 }
 0x144   :  { %v198_v42 = vmax.f32 %v197_v41, 0.0 }
 0x146   :  { %199 = vst [vmem:[#allocation7] sm:$0xff] %v198_v42 }
 0x147   :  { %328 = shalt.err (!%p325_p6)
}
 0x148   :  { %s329_s26 = scalar_lea.hbm %s439_s5, 128 }
 0x149   :  { %p330_p7 = scmp.ne.s32.totalorder %s439_s5, %s329_s26  ;;  %p333_p8 = scmp.lt.u32.totalorder %s329_s26, %s439_s5 }
 0x14b   :  { %p335_p9 = pnand %p333_p8, %p330_p7 }
 0x14d   :  { %338 = shalt.err (!%p335_p9)
}
 0x14e   :  { %209 = dma.vmem_to_hbm [thread:$0]  %s207_s23, 128, %s439_s5, [#allocation4]  }
 0x14f   :  { %343 = dma.done.wait [#allocation4], 128  }
 0x150   :  { %344 = vsyncadd [#allocation4], 4294967168 }
 0x151   :  { %213 = vsyncpa [#allocation3], 1 }
 0x152   :  { %214 = vsyncpa [#allocation6], 1 }
 0x153   :  { %215 = vsyncpa [#allocation4], 1 }

</bundles_post_ra>
